<compile_context>
chip_gen: v5e
topology: v5e:2x2
jax: 0.10.0
libtpu: 0.0.40
codegen_flags: <defaults>
</compile_context>

<pallas_src>
import functools

import jax
import jax.numpy as jnp
from jax.experimental import pallas as pl
from jax.experimental.pallas import tpu as pltpu


def _round_up(x, m):
    return ((x + m - 1) // m) * m


def _argproj_kernel(x_ref, wt_ref, b_ref, o_ref, *, softplus_rows):
    # x_ref:  (tm, K)  input rows
    # wt_ref: (N, K)   concatenated per-arg weights, transposed (resident)
    # b_ref:  (N, 1)   concatenated biases (resident)
    # o_ref:  (N, tm)  transposed, lane-dense output
    #
    # result[n, m] = sum_k wT[n, k] * x[m, k] == (x @ W)[m, n]
    y = jax.lax.dot_general(
        wt_ref[...], x_ref[...],
        dimension_numbers=(((1,), (1,)), ((), ())),   # A @ B^T -> (N, tm)
        preferred_element_type=jnp.float32,
    )
    y = y + b_ref[...]
    if softplus_rows:
        # Apply the softplus part of domain_map only to the 'scale' rows.
        row = jax.lax.broadcasted_iota(jnp.int32, y.shape, 0)
        mask = functools.reduce(
            jnp.logical_or, [row == r for r in softplus_rows])
        y = jnp.where(mask, jnp.logaddexp(y, jnp.zeros_like(y)), y)
    o_ref[...] = y.astype(o_ref.dtype)


def arg_proj_pallas(x2d, w_t, b, *, softplus_rows=(), tm=1024):
    """Fused multi-arg linear + (partial) softplus domain_map.

    x2d: (M, K) f32; w_t: (N, K) concatenated transposed weights; b: (N,).
    Returns the transposed result of shape (N, M).
    """
    M, K = x2d.shape
    N, Kw = w_t.shape
    assert K == Kw

    # Output block's last dim is tm -> keep it a multiple of 128 (lane dense),
    # but don't over-pad tiny inputs.
    tm = max(128, min(tm, _round_up(M, 128)))
    M_pad = _round_up(M, tm)
    if M_pad != M:
        x2d = jnp.pad(x2d, ((0, M_pad - M), (0, 0)))
    b2 = b.reshape(N, 1)

    kernel = functools.partial(_argproj_kernel,
                               softplus_rows=tuple(softplus_rows))
    cost = pl.CostEstimate(
        flops=2 * M_pad * K * N,
        transcendentals=2 * M_pad * len(softplus_rows),
        bytes_accessed=4 * (M_pad * K + N * K + N + N * M_pad),
    )
    out_t = pl.pallas_call(
        kernel,
        out_shape=jax.ShapeDtypeStruct((N, M_pad), x2d.dtype),
        grid_spec=pltpu.PrefetchScalarGridSpec(
            num_scalar_prefetch=0,
            grid=(M_pad // tm,),
            in_specs=[
                pl.BlockSpec((tm, K), lambda i: (i, 0)),
                pl.BlockSpec((N, K), lambda i: (0, 0)),   # resident weights
                pl.BlockSpec((N, 1), lambda i: (0, 0)),   # resident bias
            ],
            out_specs=pl.BlockSpec((N, tm), lambda i: (0, i)),
        ),
        compiler_params=pltpu.CompilerParams(
            dimension_semantics=("parallel",),
        ),
        cost_estimate=cost,
    )(x2d, w_t, b2)
    return out_t[:, :M]


def arg_proj_forward(x, params, args_dim):
    """Pallas implementation of ArgProj.forward for a Normal-style head.

    x: (batch, seq, in_features) f32
    params: dict name -> (W (in_features, dim), b (dim,))
    Returns a tuple mirroring the PyTorch module's domain_map output:
      (loc, softplus(scale)), each (batch, seq) after the trailing squeeze.
    """
    B, S, H = x.shape
    x2 = x.reshape(B * S, H)

    names = list(args_dim.keys())
    w_t = jnp.concatenate([params[n][0].T for n in names], axis=0)   # (N_total, H)
    b = jnp.concatenate([params[n][1] for n in names], axis=0)       # (N_total,)

    # Which rows of the fused projection go through softplus ('scale' args).
    softplus_rows, offsets, off = [], {}, 0
    for n in names:
        d = args_dim[n]
        offsets[n] = (off, off + d)
        if n == "scale":
            softplus_rows.extend(range(off, off + d))
        off += d

    out_t = arg_proj_pallas(x2, w_t, b,
                            softplus_rows=tuple(softplus_rows))  # (N_total, B*S)

    outs = []
    for n in names:
        lo, hi = offsets[n]
        d = hi - lo
        y = out_t[lo:hi].reshape(d, B, S)
        y = jnp.moveaxis(y, 0, -1)                     # (B, S, d)
        outs.append(y.squeeze(-1) if d == 1 else y)    # domain_map's trailing squeeze
    return tuple(outs)


def _reference(x, params, args_dim):
    outs = []
    for name in args_dim:
        w, b = params[name]
        y = jnp.einsum("bsh,hn->bsn", x, w) + b
        if name == "scale":
            y = jax.nn.softplus(y)
        outs.append(y.squeeze(-1))
    return tuple(outs)


if __name__ == "__main__":
    key = jax.random.PRNGKey(0)

    batch, seq, in_features = 2, 8, 32
    args_dim = {"loc": 1, "scale": 1}

    # Deterministic parameter init (PyTorch Linear-style uniform bound).
    params = {}
    k = key
    bound = 1.0 / jnp.sqrt(float(in_features))
    for name, dim in args_dim.items():
        k, kw, kb = jax.random.split(k, 3)
        w = jax.random.uniform(kw, (in_features, dim), jnp.float32, -bound, bound)
        b = jax.random.uniform(kb, (dim,), jnp.float32, -bound, bound)
        params[name] = (w, b)

    k, kx = jax.random.split(k)
    x = jax.random.normal(kx, (batch, seq, in_features), jnp.float32)

    out = arg_proj_forward(x, params, args_dim)
    out = jax.block_until_ready(out)

    ref = _reference(x, params, args_dim)
    for o, r in zip(out, ref):
        assert o.shape == r.shape == (batch, seq)
        assert jnp.allclose(o, r, atol=1e-5, rtol=1e-5)

    print("KERNEL_OK")
</pallas_src>

<mosaic_0001>
module attributes {stable_mosaic.version = 11 : i64} {
  func.func @_argproj_kernel(%arg0: i32, %arg1: memref<128x32xf32, #tpu.memory_space<vmem>>, %arg2: memref<2x32xf32, #tpu.memory_space<vmem>>, %arg3: memref<2x1xf32, #tpu.memory_space<vmem>>, %arg4: memref<2x128xf32, #tpu.memory_space<vmem>>) attributes {dimension_semantics = [#tpu.dimension_semantics<parallel>], iteration_bounds = array<i64: 1>, scalar_prefetch = 0 : i64, scratch_operands = 0 : i64, tpu.core_type = #tpu.core_type<tc>, window_params = [{transform_indices = @transform_0, window_bounds = array<i64: 128, 32>}, {pipeline_mode = #tpu.pipeline_mode<synchronous>, transform_indices = @transform_1, window_bounds = array<i64: 2, 32>}, {pipeline_mode = #tpu.pipeline_mode<synchronous>, transform_indices = @transform_2, window_bounds = array<i64: 2, 1>}, {transform_indices = @transform_3, window_bounds = array<i64: 2, 128>}]} {
    %c0 = arith.constant 0 : index
    %c0_0 = arith.constant 0 : index
    %0 = vector.load %arg2[%c0, %c0_0] : memref<2x32xf32, #tpu.memory_space<vmem>>, vector<2x32xf32>
    %c0_1 = arith.constant 0 : index
    %c0_2 = arith.constant 0 : index
    %1 = vector.load %arg1[%c0_1, %c0_2] : memref<128x32xf32, #tpu.memory_space<vmem>>, vector<128x32xf32>
    %cst = arith.constant dense<0.000000e+00> : vector<2x128xf32>
    %2 = tpu.matmul %0, %1, %cst {dimension_numbers = #tpu.dot_dimension_numbers<[1], [1], [0], [0], [0, 0, 1, 0], [], []>} : vector<2x32xf32>, vector<128x32xf32>, vector<2x128xf32> -> vector<2x128xf32>
    %c0_3 = arith.constant 0 : index
    %c0_4 = arith.constant 0 : index
    %3 = vector.load %arg3[%c0_3, %c0_4] : memref<2x1xf32, #tpu.memory_space<vmem>>, vector<2x1xf32>
    %4 = vector.broadcast %3 : vector<2x1xf32> to vector<2x128xf32>
    %5 = arith.addf %2, %4 : vector<2x128xf32>
    %6 = tpu.iota {dimensions = array<i32: 0>} : vector<2x128xi32>
    %c1_i32 = arith.constant 1 : i32
    %7 = vector.broadcast %c1_i32 : i32 to vector<2x128xi32>
    %8 = arith.cmpi eq, %6, %7 : vector<2x128xi32>
    %cst_5 = arith.constant 0.000000e+00 : f32
    %9 = vector.broadcast %cst_5 : f32 to vector<2x128xf32>
    %10 = arith.maximumf %5, %9 : vector<2x128xf32>
    %11 = arith.subf %5, %9 : vector<2x128xf32>
    %12 = arith.cmpf one, %11, %11 : vector<2x128xf32>
    %13 = arith.addf %5, %9 : vector<2x128xf32>
    %14 = math.absf %11 : vector<2x128xf32>
    %cst_6 = arith.constant 0.000000e+00 : f32
    %15 = vector.broadcast %cst_6 : f32 to vector<2x128xf32>
    %16 = arith.subf %15, %14 : vector<2x128xf32>
    %17 = math.exp %16 : vector<2x128xf32>
    %18 = math.log1p %17 : vector<2x128xf32>
    %19 = arith.addf %10, %18 : vector<2x128xf32>
    %20 = arith.select %12, %13, %19 : vector<2x128xi1>, vector<2x128xf32>
    %21 = arith.select %8, %20, %5 : vector<2x128xi1>, vector<2x128xf32>
    %c0_7 = arith.constant 0 : index
    %c0_8 = arith.constant 0 : index
    %22 = vector.load %arg4[%c0_7, %c0_8] : memref<2x128xf32, #tpu.memory_space<vmem>>, vector<2x128xf32>
    tpu.vector_store %arg4[%c0_7, %c0_8], %21 {strides = array<i32>} : memref<2x128xf32, #tpu.memory_space<vmem>>, vector<2x128xf32>,
    return
  }
  func.func @transform_0(%arg0: i32) -> (i32, i32) {
    %c0_i32 = arith.constant 0 : i32
    %c0_i32_0 = arith.constant 0 : i32
    return %arg0, %c0_i32 : i32, i32
  }
  func.func @transform_1(%arg0: i32) -> (i32, i32) {
    %c0_i32 = arith.constant 0 : i32
    %c0_i32_0 = arith.constant 0 : i32
    %c0_i32_1 = arith.constant 0 : i32
    return %c0_i32, %c0_i32_0 : i32, i32
  }
  func.func @transform_2(%arg0: i32) -> (i32, i32) {
    %c0_i32 = arith.constant 0 : i32
    %c0_i32_0 = arith.constant 0 : i32
    %c0_i32_1 = arith.constant 0 : i32
    return %c0_i32, %c0_i32_0 : i32, i32
  }
  func.func @transform_3(%arg0: i32) -> (i32, i32) {
    %c0_i32 = arith.constant 0 : i32
    %c0_i32_0 = arith.constant 0 : i32
    return %c0_i32, %arg0 : i32, i32
  }
}

</mosaic_0001>

<bundles_post_ra>
// kernel: tpu_custom_call.1
= control target key start
LH: loop header
LB: loop body
LE: loop exit
PB: predicated region body
PF: predicated region fallthrough
CT: control target
= control target key end

     0   :  { %vm38_vm0 = vcmask 261120   ;;  %s295_s0 = inlined_call_operand.vmem [shape: f32[128,32], index: 0, kind: input, shape index: {}]   ;;  %s296_s1 = inlined_call_operand.vmem [shape: f32[2,32], index: 1, kind: input, shape index: {}]   ;;  %s297_s2 = inlined_call_operand.vmem [shape: f32[2,1], index: 2, kind: input, shape index: {}]   ;;  %s298_s3 = inlined_call_operand.hbm [shape: f32[2,128], index: 3, kind: output, shape index: {}]  }
   0x1   :  { %v31_v0 = vld [vmem:[%s295_s0 + $0x78] sm:$0xff]  ;;  %v30_v1 = vld [vmem:[%s295_s0 + $0x70] sm:$0xff] }
   0x2   :  { %149 = vmatpush.xpose.msk.msra.mxu0 %vm38_vm0, %v31_v0 }
   0x3   :  { %8 = vsyncpa [#allocation3], 0  ;;  %v29_v2 = vld [vmem:[%s295_s0 + $0x68] sm:$0xff]  ;;  %v28_v3 = vld [vmem:[%s295_s0 + $0x60] sm:$0xff]  ;;  %v199_v10 = vmov 0   ;;  %v110_v28 = vlaneseq  ;;  %s140_s22 = sshll.u32 %s298_s3, 4  ;;  %s141_s22 = int_to_ptr.hbm [resolvable:$true] %s140_s22 }
   0x4   :  { %v27_v4 = vld [vmem:[%s295_s0 + $0x58] sm:$0xff]  ;;  %v26_v5 = vld [vmem:[%s295_s0 + $0x50] sm:$0xff]  ;;  %v25_v6 = vld [vmem:[%s295_s0 + $0x48] sm:$0xff]  ;;  %168 = vset.pattern.permute.xlu0 %v199_v10 }
   0x5   :  { %v24_v7 = vld [vmem:[%s295_s0 + $0x40] sm:$0xff]  ;;  %v23_v8 = vld [vmem:[%s295_s0 + $0x38] sm:$0xff]  ;;  %v22_v11 = vld [vmem:[%s295_s0 + $0x30] sm:$0xff]  ;;  %v111_v32 = vshrl.u32 %v110_v28, 7 }
   0x6   :  { %150 = vmatpush.xpose.msk.msra.mxu0 %vm38_vm0, %v30_v1  ;;  %v32_v9 = vld [vmem:[%s297_s2] sm:$0x3]  ;;  %v21_v12 = vld [vmem:[%s295_s0 + $0x28] sm:$0xff]  ;;  %v19_v14 = vld [vmem:[%s295_s0 + $0x18] sm:$0xff] }
   0x7   :  { %35 = vperm.xlu0 %168, %v32_v9   ;;  %v20_v13 = vld [vmem:[%s295_s0 + $0x20] sm:$0xff]  ;;  %v18_v15 = vld [vmem:[%s295_s0 + $0x10] sm:$0xff]  ;;  %v17_v16 = vld [vmem:[%s295_s0 + $0x8] sm:$0xff]  ;;  %vm112_vm2 = vcmp.eq.s32.totalorder %v111_v32, 1 }
   0x8   :  { %v16_v17 = vld [vmem:[%s295_s0] sm:$0xff]  ;;  %s200_s0 = smov [#allocation2]  }
   0x9   :  { %v15_v18 = vld [vmem:[%s296_s1] sm:$0x3]  ;;  %s138_s1 = sshll.u32 %s200_s0, 4  ;;  %s139_s1 = int_to_ptr.vmem [resolvable:$true] %s138_s1 }
   0xa   :  { %151 = vmatpush.xpose.msk.msra.mxu0 %vm38_vm0, %v29_v2 }
   0xe   :  { %152 = vmatpush.xpose.msk.msra.mxu0 %vm38_vm0, %v28_v3 }
  0x12   :  { %153 = vmatpush.xpose.msk.msra.mxu0 %vm38_vm0, %v27_v4 }
  0x16   :  { %154 = vmatpush.xpose.msk.msra.mxu0 %vm38_vm0, %v26_v5 }
  0x1a   :  { %155 = vmatpush.xpose.msk.msra.mxu0 %vm38_vm0, %v25_v6 }
  0x1e   :  { %156 = vmatpush.xpose.msk.msra.mxu0 %vm38_vm0, %v24_v7 }
  0x22   :  { %157 = vmatpush.xpose.msk.msra.mxu0 %vm38_vm0, %v23_v8 }
  0x26   :  { %158 = vmatpush.xpose.msk.msra.mxu0 %vm38_vm0, %v22_v11 }
  0x2a   :  { %159 = vmatpush.xpose.msk.msra.mxu0 %vm38_vm0, %v21_v12 }
  0x2e   :  { %160 = vmatpush.xpose.msk.msra.mxu0 %vm38_vm0, %v20_v13 }
  0x32   :  { %161 = vmatpush.xpose.msk.msra.mxu0 %vm38_vm0, %v19_v14 }
  0x36   :  { %162 = vmatpush.xpose.msk.msra.mxu0 %vm38_vm0, %v18_v15 }
  0x3a   :  { %163 = vmatpush.xpose.msk.msra.mxu0 %vm38_vm0, %v17_v16 }
  0x3e   :  { %164 = vmatpush.xpose.msk.msra.mxu0 %vm38_vm0, %v16_v17 }
  0x41   :  { %165 = vmatmul.msk.f32.vlgmr.msra.gmra.mxu0 %vm38_vm0, %v15_v18 }
  0x79   :  { %v36_v19 = vpop.permute.xlu0 %35 }
  0xbe   :  { %v107_v20 = vpop.f32.mrf.mxu0 }
  0xbf   :  { %v108_v21 = vadd.f32 %v107_v20, %v36_v19 }
  0xc1   :  { %v116_v22 = vand.u32 2147483647, %v108_v21  ;;  %v113_v35 = vmax.f32 %v108_v21, 0.0  ;;  %vm114_vm3 = vcmp.ne.f32.partialorder %v108_v21, %v108_v21 }
  0xc3   :  { %v117_v23 = vsub.f32 0.0, %v116_v22 }
  0xc5   :  { %v118_v24 = vmul.f32 1.442695, %v117_v23 }
  0xc7   :  { %169 = vpow2.f32 %v118_v24 }
  0xcd   :  { %v170_v25 = vpop.eup %169 }
  0xce   :  { %v120_v26 = vadd.f32 1.0, %v170_v25  ;;  %v123_v27 = vmul.f32 -0.5, %v170_v25  ;;  %v126_v30 = vand.u32 2147483647, %v170_v25 }
  0xd0   :  { %171 = vlog2.f32 %v120_v26  ;;  %v124_v29 = vadd.f32 1.0, %v123_v27  ;;  %vm127_vm1 = vcmp.lt.f32.partialorder %v126_v30, 0.0004427343 }
  0xd2   :  { %v125_v34 = vmul.f32 %v170_v25, %v124_v29 }
  0xd6   :  { %v172_v31 = vpop.eup %171 }
  0xd7   :  { %v122_v33 = vmul.f32 0.6931472, %v172_v31 }
  0xd9   :  { %v128_v36 = vsel %vm127_vm1, %v125_v34, %v122_v33 }
  0xda   :  { %v129_v37 = vadd.f32 %v128_v36, %v113_v35 }
  0xdc   :  { %v130_v38 = vsel %vm114_vm3, %v108_v21, %v129_v37 }
  0xdd   :  { %v131_v39 = vsel %vm112_vm2, %v130_v38, %v108_v21 }
  0xde   :  { %132 = vst [vmem:[#allocation2] sm:$0x3] %v131_v39 }
  0xdf   :  { %143 = dma.vmem_to_hbm [thread:$0]  %s139_s1, 32, %s141_s22, [#allocation3]  }
  0xe0   :  { %197 = dma.done.wait [#allocation3], 32  }
  0xe1   :  { %198 = vsyncadd [#allocation3], 4294967264 }
  0xe2   :  { %148 = vsyncpa [#allocation3], 1 }

</bundles_post_ra>
